<compile_context>
chip_gen: v5e
topology: v5e:2x2
jax: 0.10.0
libtpu: 0.0.40
codegen_flags: <defaults>
</compile_context>

<pallas_src>
import functools
import math

import jax
import jax.numpy as jnp
from jax.experimental import pallas as pl
from jax.experimental.pallas import tpu as pltpu


# ---------------------------------------------------------------------------
# helpers
# ---------------------------------------------------------------------------

def _round_up(x: int, m: int) -> int:
    return ((x + m - 1) // m) * m


def _pad_2d(a, rows: int, cols: int):
    r, c = a.shape
    if r == rows and c == cols:
        return a
    return jnp.pad(a, ((0, rows - r), (0, cols - c)))


_VMEM_LIMIT_BYTES = 32 * 1024 * 1024          # safe on v5e/v6e/v7x
_FUSED_VMEM_BUDGET = 16 * 1024 * 1024         # use fused path below this


# ---------------------------------------------------------------------------
# fused whole-MLP kernel (small / medium networks: weights resident in VMEM)
# ---------------------------------------------------------------------------

def _fused_mlp_kernel(x_ref, *refs, n_layers: int, compute_dtype):
    o_ref = refs[-1]
    wb_refs = refs[:-1]
    act = x_ref[...]                                   # (tm, d0_p) compute_dtype
    for i in range(n_layers):                          # unrolled at trace time
        w = wb_refs[2 * i][...]
        b = wb_refs[2 * i + 1][...]                    # (1, dout_p) f32
        y = jnp.dot(act, w, preferred_element_type=jnp.float32)
        y = y + b.astype(jnp.float32)
        if i < n_layers - 1:
            y = jnp.maximum(y, 0.0)                    # ReLU on hidden layers only
            act = y.astype(compute_dtype)              # feed next MXU pass
        else:
            act = y
    o_ref[...] = act.astype(o_ref.dtype)


def mlp_forward_fused(x, params, *, compute_dtype=jnp.float32):
    """Whole MLP in a single pallas_call. x: (B, d0); params: [(W, b), ...]."""
    B, d_in = x.shape
    out_dtype = x.dtype
    n_layers = len(params)

    dims = [d_in] + [w.shape[1] for (w, _b) in params]
    dims_p = [_round_up(d, 128) for d in dims]         # lane-dense feature dims

    # sublane-aligned batch tiling; tile by 128 rows when the batch is large
    if B <= 128:
        tm = _round_up(B, 8)
        m_pad = tm
    else:
        tm = 128
        m_pad = _round_up(B, tm)

    cd = jnp.dtype(compute_dtype)
    x_p = _pad_2d(x, m_pad, dims_p[0]).astype(compute_dtype)

    inputs = [x_p]
    in_specs = [pl.BlockSpec((tm, dims_p[0]), lambda i: (i, 0))]
    flops = 0
    bytes_accessed = x_p.size * cd.itemsize
    for li, (w, b) in enumerate(params):
        din_p, dout_p = dims_p[li], dims_p[li + 1]
        w_p = _pad_2d(w, din_p, dout_p).astype(compute_dtype)
        b_p = _pad_2d(b.reshape(1, -1), 1, dout_p).astype(jnp.float32)
        inputs += [w_p, b_p]
        in_specs += [
            pl.BlockSpec((din_p, dout_p), lambda i: (0, 0)),  # weight resident
            pl.BlockSpec((1, dout_p), lambda i: (0, 0)),      # bias resident
        ]
        flops += 2 * m_pad * din_p * dout_p
        bytes_accessed += w_p.size * cd.itemsize + b_p.size * 4

    d_out_p = dims_p[-1]
    bytes_accessed += m_pad * d_out_p * jnp.dtype(out_dtype).itemsize

    kernel = functools.partial(
        _fused_mlp_kernel, n_layers=n_layers, compute_dtype=compute_dtype)

    out_p = pl.pallas_call(
        kernel,
        out_shape=jax.ShapeDtypeStruct((m_pad, d_out_p), out_dtype),
        grid=(m_pad // tm,),
        in_specs=in_specs,
        out_specs=pl.BlockSpec((tm, d_out_p), lambda i: (i, 0)),
        compiler_params=pltpu.CompilerParams(
            dimension_semantics=("parallel",),          # megacore over batch
            vmem_limit_bytes=_VMEM_LIMIT_BYTES,
        ),
        cost_estimate=pl.CostEstimate(
            flops=int(flops), transcendentals=0,
            bytes_accessed=int(bytes_accessed)),
    )(*inputs)

    return out_p[:B, :dims[-1]]


# ---------------------------------------------------------------------------
# tiled (M, N, K) linear kernel (fallback for large layers)
# ---------------------------------------------------------------------------

def _tiled_linear_kernel(x_ref, w_ref, b_ref, o_ref, acc_ref, *, apply_relu: bool):
    k = pl.program_id(2)

    @pl.when(k == 0)
    def _():
        acc_ref[...] = jnp.zeros_like(acc_ref)

    acc_ref[...] += jnp.dot(x_ref[...], w_ref[...],
                            preferred_element_type=jnp.float32)

    @pl.when(k == pl.num_programs(2) - 1)
    def _():
        y = acc_ref[...] + b_ref[...].astype(jnp.float32)   # epilogue only
        if apply_relu:
            y = jnp.maximum(y, 0.0)
        o_ref[...] = y.astype(o_ref.dtype)


def pallas_linear_tiled(x, w, b, *, apply_relu: bool,
                        compute_dtype=jnp.bfloat16,
                        tm=256, tn=256, tk=512):
    """y = relu?(x @ w + b), tiled over (M, N, K) with an f32 accumulator."""
    B, K = x.shape
    K2, N = w.shape
    assert K == K2
    out_dtype = x.dtype
    cd = jnp.dtype(compute_dtype)

    tm = tm if B > tm else _round_up(B, 8)
    tn = min(tn, _round_up(N, 128))
    tk = min(tk, _round_up(K, 128))

    m_pad = _round_up(B, tm)
    n_pad = _round_up(N, tn)
    k_pad = _round_up(K, tk)

    x_p = _pad_2d(x, m_pad, k_pad).astype(compute_dtype)
    w_p = _pad_2d(w, k_pad, n_pad).astype(compute_dtype)
    b_p = _pad_2d(b.reshape(1, -1), 1, n_pad).astype(jnp.float32)

    kernel = functools.partial(_tiled_linear_kernel, apply_relu=apply_relu)

    out_p = pl.pallas_call(
        kernel,
        out_shape=jax.ShapeDtypeStruct((m_pad, n_pad), out_dtype),
        grid=(m_pad // tm, n_pad // tn, k_pad // tk),
        in_specs=[
            pl.BlockSpec((tm, tk), lambda i, j, k: (i, k)),
            pl.BlockSpec((tk, tn), lambda i, j, k: (k, j)),
            pl.BlockSpec((1, tn), lambda i, j, k: (0, j)),   # bias reused over K
        ],
        out_specs=pl.BlockSpec((tm, tn), lambda i, j, k: (i, j)),
        scratch_shapes=[pltpu.VMEM((tm, tn), jnp.float32)],
        compiler_params=pltpu.CompilerParams(
            dimension_semantics=("parallel", "parallel", "arbitrary"),
            vmem_limit_bytes=_VMEM_LIMIT_BYTES,
        ),
        cost_estimate=pl.CostEstimate(
            flops=int(2 * m_pad * n_pad * k_pad),
            transcendentals=0,
            bytes_accessed=int(x_p.size * cd.itemsize
                               + w_p.size * cd.itemsize
                               + b_p.size * 4
                               + m_pad * n_pad * jnp.dtype(out_dtype).itemsize)),
    )(x_p, w_p, b_p)

    return out_p[:B, :N]


# ---------------------------------------------------------------------------
# MLP forward (matches MLP.forward semantics)
# ---------------------------------------------------------------------------

def mlp_forward(x, params, *, compute_dtype=jnp.float32):
    """ReLU on all but the last layer; no output activation; 1-D x unsqueezed."""
    if x.ndim == 1:
        x = x[None, :]

    # Heuristic: if all (padded) weights + activations fit comfortably in
    # VMEM, fuse the whole network into one kernel; otherwise fall back to a
    # tiled matmul per layer.
    itemsize = jnp.dtype(compute_dtype).itemsize
    dims = [x.shape[1]] + [w.shape[1] for (w, _b) in params]
    dims_p = [_round_up(d, 128) for d in dims]
    weight_bytes = sum(dims_p[i] * dims_p[i + 1] * itemsize + dims_p[i + 1] * 4
                       for i in range(len(params)))
    tm = min(_round_up(x.shape[0], 8), 128)
    act_bytes = 4 * tm * max(dims_p) * 4                 # rough, incl. buffering

    if weight_bytes + act_bytes <= _FUSED_VMEM_BUDGET:
        return mlp_forward_fused(x, params, compute_dtype=compute_dtype)

    n = len(params)
    y = x
    for i, (w, b) in enumerate(params):
        y = pallas_linear_tiled(y, w, b, apply_relu=(i < n - 1),
                                compute_dtype=compute_dtype)
    return y


# ---------------------------------------------------------------------------
# params / reference
# ---------------------------------------------------------------------------

def init_mlp_params(sizes, key):
    """PyTorch nn.Linear-style init: U(-1/sqrt(fan_in), 1/sqrt(fan_in))."""
    params = []
    for i in range(len(sizes) - 1):
        fan_in, fan_out = sizes[i], sizes[i + 1]
        key, kw, kb = jax.random.split(key, 3)
        bound = 1.0 / math.sqrt(fan_in)
        w = jax.random.uniform(kw, (fan_in, fan_out), jnp.float32, -bound, bound)
        b = jax.random.uniform(kb, (fan_out,), jnp.float32, -bound, bound)
        params.append((w, b))
    return params


def mlp_reference(x, params):
    if x.ndim == 1:
        x = x[None, :]
    n = len(params)
    for i, (w, b) in enumerate(params):
        x = x @ w + b
        if i < n - 1:
            x = jnp.maximum(x, 0.0)
    return x


# ---------------------------------------------------------------------------
# demo / correctness check
# ---------------------------------------------------------------------------

if __name__ == "__main__":
    key = jax.random.PRNGKey(0)

    # ---- small MLP (module's typical use): fused single-kernel path -------
    sizes = [16, 32, 32, 8]
    batch = 2
    key, kx, kp = jax.random.split(key, 3)
    x = jax.random.normal(kx, (batch, sizes[0]), jnp.float32)
    params = init_mlp_params(sizes, kp)

    fwd = jax.jit(functools.partial(mlp_forward, compute_dtype=jnp.float32))
    out = fwd(x, params)
    jax.block_until_ready(out)

    ref = mlp_reference(x, params)
    assert out.shape == (batch, sizes[-1])
    assert jnp.allclose(out, ref, atol=1e-5, rtol=1e-5), float(
        jnp.max(jnp.abs(out - ref)))

    # ---- larger, unaligned layer: tiled (M, N, K) bf16 path ---------------
    key, kx2, kp2 = jax.random.split(key, 3)
    sizes2 = [300, 520, 200]          # unaligned on purpose -> exercises padding
    x2 = jax.random.normal(kx2, (200, sizes2[0]), jnp.float32)
    params2 = init_mlp_params(sizes2, kp2)
    y2 = x2
    for i, (w, b) in enumerate(params2):
        y2 = pallas_linear_tiled(y2, w, b, apply_relu=(i < len(params2) - 1),
                                 compute_dtype=jnp.bfloat16)
    jax.block_until_ready(y2)
    ref2 = mlp_reference(x2, params2)
    assert y2.shape == ref2.shape
    assert jnp.allclose(y2, ref2, atol=5e-2, rtol=5e-2), float(
        jnp.max(jnp.abs(y2 - ref2)))

    print("KERNEL_OK")
</pallas_src>

<mosaic_0001>
module attributes {stable_mosaic.version = 11 : i64} {
  func.func @_fused_mlp_kernel(%arg0: i32, %arg1: memref<8x128xf32, #tpu.memory_space<vmem>>, %arg2: memref<128x128xf32, #tpu.memory_space<vmem>>, %arg3: memref<1x128xf32, #tpu.memory_space<vmem>>, %arg4: memref<128x128xf32, #tpu.memory_space<vmem>>, %arg5: memref<1x128xf32, #tpu.memory_space<vmem>>, %arg6: memref<128x128xf32, #tpu.memory_space<vmem>>, %arg7: memref<1x128xf32, #tpu.memory_space<vmem>>, %arg8: memref<8x128xf32, #tpu.memory_space<vmem>>) attributes {dimension_semantics = [#tpu.dimension_semantics<parallel>], iteration_bounds = array<i64: 1>, scalar_prefetch = 0 : i64, scratch_operands = 0 : i64, tpu.core_type = #tpu.core_type<tc>, window_params = [{transform_indices = @transform_0, window_bounds = array<i64: 8, 128>}, {pipeline_mode = #tpu.pipeline_mode<synchronous>, transform_indices = @transform_1, window_bounds = array<i64: 128, 128>}, {pipeline_mode = #tpu.pipeline_mode<synchronous>, transform_indices = @transform_2, window_bounds = array<i64: 1, 128>}, {pipeline_mode = #tpu.pipeline_mode<synchronous>, transform_indices = @transform_3, window_bounds = array<i64: 128, 128>}, {pipeline_mode = #tpu.pipeline_mode<synchronous>, transform_indices = @transform_4, window_bounds = array<i64: 1, 128>}, {pipeline_mode = #tpu.pipeline_mode<synchronous>, transform_indices = @transform_5, window_bounds = array<i64: 128, 128>}, {pipeline_mode = #tpu.pipeline_mode<synchronous>, transform_indices = @transform_6, window_bounds = array<i64: 1, 128>}, {transform_indices = @transform_7, window_bounds = array<i64: 8, 128>}]} {
    %c0 = arith.constant 0 : index
    %c0_0 = arith.constant 0 : index
    %0 = vector.load %arg1[%c0, %c0_0] : memref<8x128xf32, #tpu.memory_space<vmem>>, vector<8x128xf32>
    %c0_1 = arith.constant 0 : index
    %c0_2 = arith.constant 0 : index
    %1 = vector.load %arg2[%c0_1, %c0_2] : memref<128x128xf32, #tpu.memory_space<vmem>>, vector<128x128xf32>
    %c0_3 = arith.constant 0 : index
    %c0_4 = arith.constant 0 : index
    %2 = vector.load %arg3[%c0_3, %c0_4] : memref<1x128xf32, #tpu.memory_space<vmem>>, vector<1x128xf32>
    %cst = arith.constant dense<0.000000e+00> : vector<8x128xf32>
    %3 = tpu.matmul %0, %1, %cst {dimension_numbers = #tpu.dot_dimension_numbers<[1], [0], [0], [1], [0, 0, 1, 1], [], []>} : vector<8x128xf32>, vector<128x128xf32>, vector<8x128xf32> -> vector<8x128xf32>
    %4 = vector.broadcast %2 : vector<1x128xf32> to vector<8x128xf32>
    %5 = arith.addf %3, %4 : vector<8x128xf32>
    %cst_5 = arith.constant 0.000000e+00 : f32
    %6 = vector.broadcast %cst_5 : f32 to vector<8x128xf32>
    %7 = arith.maximumf %5, %6 : vector<8x128xf32>
    %c0_6 = arith.constant 0 : index
    %c0_7 = arith.constant 0 : index
    %8 = vector.load %arg4[%c0_6, %c0_7] : memref<128x128xf32, #tpu.memory_space<vmem>>, vector<128x128xf32>
    %c0_8 = arith.constant 0 : index
    %c0_9 = arith.constant 0 : index
    %9 = vector.load %arg5[%c0_8, %c0_9] : memref<1x128xf32, #tpu.memory_space<vmem>>, vector<1x128xf32>
    %cst_10 = arith.constant dense<0.000000e+00> : vector<8x128xf32>
    %10 = tpu.matmul %7, %8, %cst_10 {dimension_numbers = #tpu.dot_dimension_numbers<[1], [0], [0], [1], [0, 0, 1, 1], [], []>} : vector<8x128xf32>, vector<128x128xf32>, vector<8x128xf32> -> vector<8x128xf32>
    %11 = vector.broadcast %9 : vector<1x128xf32> to vector<8x128xf32>
    %12 = arith.addf %10, %11 : vector<8x128xf32>
    %cst_11 = arith.constant 0.000000e+00 : f32
    %13 = vector.broadcast %cst_11 : f32 to vector<8x128xf32>
    %14 = arith.maximumf %12, %13 : vector<8x128xf32>
    %c0_12 = arith.constant 0 : index
    %c0_13 = arith.constant 0 : index
    %15 = vector.load %arg6[%c0_12, %c0_13] : memref<128x128xf32, #tpu.memory_space<vmem>>, vector<128x128xf32>
    %c0_14 = arith.constant 0 : index
    %c0_15 = arith.constant 0 : index
    %16 = vector.load %arg7[%c0_14, %c0_15] : memref<1x128xf32, #tpu.memory_space<vmem>>, vector<1x128xf32>
    %cst_16 = arith.constant dense<0.000000e+00> : vector<8x128xf32>
    %17 = tpu.matmul %14, %15, %cst_16 {dimension_numbers = #tpu.dot_dimension_numbers<[1], [0], [0], [1], [0, 0, 1, 1], [], []>} : vector<8x128xf32>, vector<128x128xf32>, vector<8x128xf32> -> vector<8x128xf32>
    %18 = vector.broadcast %16 : vector<1x128xf32> to vector<8x128xf32>
    %19 = arith.addf %17, %18 : vector<8x128xf32>
    %c0_17 = arith.constant 0 : index
    %c0_18 = arith.constant 0 : index
    %20 = vector.load %arg8[%c0_17, %c0_18] : memref<8x128xf32, #tpu.memory_space<vmem>>, vector<8x128xf32>
    tpu.vector_store %arg8[%c0_17, %c0_18], %19 {strides = array<i32>} : memref<8x128xf32, #tpu.memory_space<vmem>>, vector<8x128xf32>,
    return
  }
  func.func @transform_0(%arg0: i32) -> (i32, i32) {
    %c0_i32 = arith.constant 0 : i32
    %c0_i32_0 = arith.constant 0 : i32
    return %arg0, %c0_i32 : i32, i32
  }
  func.func @transform_1(%arg0: i32) -> (i32, i32) {
    %c0_i32 = arith.constant 0 : i32
    %c0_i32_0 = arith.constant 0 : i32
    %c0_i32_1 = arith.constant 0 : i32
    return %c0_i32, %c0_i32_0 : i32, i32
  }
  func.func @transform_2(%arg0: i32) -> (i32, i32) {
    %c0_i32 = arith.constant 0 : i32
    %c0_i32_0 = arith.constant 0 : i32
    %c0_i32_1 = arith.constant 0 : i32
    return %c0_i32, %c0_i32_0 : i32, i32
  }
  func.func @transform_3(%arg0: i32) -> (i32, i32) {
    %c0_i32 = arith.constant 0 : i32
    %c0_i32_0 = arith.constant 0 : i32
    %c0_i32_1 = arith.constant 0 : i32
    return %c0_i32, %c0_i32_0 : i32, i32
  }
  func.func @transform_4(%arg0: i32) -> (i32, i32) {
    %c0_i32 = arith.constant 0 : i32
    %c0_i32_0 = arith.constant 0 : i32
    %c0_i32_1 = arith.constant 0 : i32
    return %c0_i32, %c0_i32_0 : i32, i32
  }
  func.func @transform_5(%arg0: i32) -> (i32, i32) {
    %c0_i32 = arith.constant 0 : i32
    %c0_i32_0 = arith.constant 0 : i32
    %c0_i32_1 = arith.constant 0 : i32
    return %c0_i32, %c0_i32_0 : i32, i32
  }
  func.func @transform_6(%arg0: i32) -> (i32, i32) {
    %c0_i32 = arith.constant 0 : i32
    %c0_i32_0 = arith.constant 0 : i32
    %c0_i32_1 = arith.constant 0 : i32
    return %c0_i32, %c0_i32_0 : i32, i32
  }
  func.func @transform_7(%arg0: i32) -> (i32, i32) {
    %c0_i32 = arith.constant 0 : i32
    %c0_i32_0 = arith.constant 0 : i32
    return %arg0, %c0_i32 : i32, i32
  }
}

</mosaic_0001>

<bundles_post_ra>
// kernel: mlp_forward.1
= control target key start
LH: loop header
LB: loop body
LE: loop exit
PB: predicated region body
PF: predicated region fallthrough
CT: control target
= control target key end

     0   :  { %s356_s1 = inlined_call_operand.vmem [shape: f32[128,128], index: 1, kind: input, shape index: {}]   ;;  %s357_s3 = inlined_call_operand.vmem [shape: f32[128,128], index: 3, kind: input, shape index: {}]   ;;  %s358_s2 = inlined_call_operand.vmem [shape: f32[1,128], index: 2, kind: input, shape index: {}]   ;;  %s359_s0 = inlined_call_operand.vmem [shape: f32[8,128], index: 0, kind: input, shape index: {}]   ;;  %s360_s4 = inlined_call_operand.vmem [shape: f32[1,128], index: 4, kind: input, shape index: {}]   ;;  %s361_s5 = inlined_call_operand.vmem [shape: f32[128,128], index: 5, kind: input, shape index: {}]   ;;  %s362_s6 = inlined_call_operand.vmem [shape: f32[1,128], index: 6, kind: input, shape index: {}]   ;;  %s363_s7 = inlined_call_operand.vmem [shape: f32[8,128], index: 7, kind: output, shape index: {}]  }
   0x1   :  { %v42_v0 = vld [vmem:[%s356_s1 + $0x78] sm:$0xff]  ;;  %v41_v1 = vld [vmem:[%s356_s1 + $0x70] sm:$0xff]  ;;  %v40_v2 = vld [vmem:[%s356_s1 + $0x68] sm:$0xff] }
   0x2   :  { %47 = vmatpush.msra.mxu0 %v42_v0  ;;  %v39_v3 = vld [vmem:[%s356_s1 + $0x60] sm:$0xff]  ;;  %v83_v4 = vld [vmem:[%s357_s3 + $0x78] sm:$0xff]  ;;  %v82_v6 = vld [vmem:[%s357_s3 + $0x70] sm:$0xff] }
   0x3   :  { %v38_v5 = vld [vmem:[%s356_s1 + $0x58] sm:$0xff]  ;;  %88 = vmatpush.msra.mxu1 %v83_v4  ;;  %v81_v7 = vld [vmem:[%s357_s3 + $0x68] sm:$0xff]  ;;  %v37_v8 = vld [vmem:[%s356_s1 + $0x50] sm:$0xff] }
   0x4   :  { %48 = vmatpush.msra.mxu0 %v41_v1  ;;  %v80_v9 = vld [vmem:[%s357_s3 + $0x60] sm:$0xff]  ;;  %v36_v10 = vld [vmem:[%s356_s1 + $0x48] sm:$0xff]  ;;  %v79_v11 = vld [vmem:[%s357_s3 + $0x58] sm:$0xff] }
   0x5   :  { %89 = vmatpush.msra.mxu1 %v82_v6  ;;  %v35_v12 = vld [vmem:[%s356_s1 + $0x40] sm:$0xff]  ;;  %v78_v13 = vld [vmem:[%s357_s3 + $0x50] sm:$0xff]  ;;  %v34_v14 = vld [vmem:[%s356_s1 + $0x38] sm:$0xff] }
   0x6   :  { %49 = vmatpush.msra.mxu0 %v40_v2  ;;  %v77_v15 = vld [vmem:[%s357_s3 + $0x48] sm:$0xff]  ;;  %v33_v16 = vld [vmem:[%s356_s1 + $0x30] sm:$0xff]  ;;  %v76_v17 = vld [vmem:[%s357_s3 + $0x40] sm:$0xff] }
   0x7   :  { %90 = vmatpush.msra.mxu1 %v81_v7  ;;  %v32_v18 = vld [vmem:[%s356_s1 + $0x28] sm:$0xff]  ;;  %v75_v19 = vld [vmem:[%s357_s3 + $0x38] sm:$0xff]  ;;  %v31_v20 = vld [vmem:[%s356_s1 + $0x20] sm:$0xff] }
   0x8   :  { %50 = vmatpush.msra.mxu0 %v39_v3  ;;  %v74_v21 = vld [vmem:[%s357_s3 + $0x30] sm:$0xff]  ;;  %v30_v22 = vld [vmem:[%s356_s1 + $0x18] sm:$0xff]  ;;  %v73_v23 = vld [vmem:[%s357_s3 + $0x28] sm:$0xff] }
   0x9   :  { %91 = vmatpush.msra.mxu1 %v80_v9  ;;  %v29_v24 = vld [vmem:[%s356_s1 + $0x10] sm:$0xff]  ;;  %v72_v25 = vld [vmem:[%s357_s3 + $0x20] sm:$0xff]  ;;  %v28_v26 = vld [vmem:[%s356_s1 + $0x8] sm:$0xff] }
   0xa   :  { %51 = vmatpush.msra.mxu0 %v38_v5  ;;  %v71_v27 = vld [vmem:[%s357_s3 + $0x18] sm:$0xff]  ;;  %v27_v28 = vld [vmem:[%s356_s1] sm:$0xff]  ;;  %v70_v30 = vld [vmem:[%s357_s3 + $0x10] sm:$0xff] }
   0xb   :  { %92 = vmatpush.msra.mxu1 %v79_v11  ;;  %v26_v29 = vld [vmem:[%s359_s0] sm:$0xff]  ;;  %v69_v31 = vld [vmem:[%s357_s3 + $0x8] sm:$0xff]  ;;  %v124_v33 = vld [vmem:[%s361_s5 + $0x78] sm:$0xff] }
   0xc   :  { %52 = vmatpush.msra.mxu0 %v37_v8  ;;  %v68_v32 = vld [vmem:[%s357_s3] sm:$0xff]  ;;  %v123_v34 = vld [vmem:[%s361_s5 + $0x70] sm:$0xff]  ;;  %129 = vmatpush.msra.mxu2 %v124_v33  ;;  %v122_v35 = vld [vmem:[%s361_s5 + $0x68] sm:$0xff] }
   0xd   :  { %93 = vmatpush.msra.mxu1 %v78_v13  ;;  %v121_v36 = vld [vmem:[%s361_s5 + $0x60] sm:$0xff]  ;;  %v120_v37 = vld [vmem:[%s361_s5 + $0x58] sm:$0xff]  ;;  %v119_v38 = vld [vmem:[%s361_s5 + $0x50] sm:$0xff] }
   0xe   :  { %53 = vmatpush.msra.mxu0 %v36_v10  ;;  %130 = vmatpush.msra.mxu2 %v123_v34  ;;  %v118_v39 = vld [vmem:[%s361_s5 + $0x48] sm:$0xff]  ;;  %v117_v40 = vld [vmem:[%s361_s5 + $0x40] sm:$0xff]  ;;  %v116_v41 = vld [vmem:[%s361_s5 + $0x38] sm:$0xff] }
   0xf   :  { %94 = vmatpush.msra.mxu1 %v77_v15  ;;  %v115_v42 = vld [vmem:[%s361_s5 + $0x30] sm:$0xff]  ;;  %v114_v43 = vld [vmem:[%s361_s5 + $0x28] sm:$0xff]  ;;  %v113_v44 = vld [vmem:[%s361_s5 + $0x20] sm:$0xff] }
  0x10   :  { %54 = vmatpush.msra.mxu0 %v35_v12  ;;  %131 = vmatpush.msra.mxu2 %v122_v35  ;;  %v112_v45 = vld [vmem:[%s361_s5 + $0x18] sm:$0xff]  ;;  %v154_v46 = vld [vmem:[%s358_s2] ss:$0 sm:$0xff]  ;;  %v111_v50 = vld [vmem:[%s361_s5 + $0x10] sm:$0xff] }
  0x11   :  { %95 = vmatpush.msra.mxu1 %v76_v17  ;;  %v110_v51 = vld [vmem:[%s361_s5 + $0x8] sm:$0xff]  ;;  %v109_v52 = vld [vmem:[%s361_s5] sm:$0xff] }
  0x12   :  { %55 = vmatpush.msra.mxu0 %v34_v14  ;;  %132 = vmatpush.msra.mxu2 %v121_v36  ;;  %v155_v53 = vld [vmem:[%s360_s4] ss:$0 sm:$0xff] }
  0x13   :  { %96 = vmatpush.msra.mxu1 %v75_v19  ;;  %v156_v57 = vld [vmem:[%s362_s6] ss:$0 sm:$0xff] }
  0x14   :  { %56 = vmatpush.msra.mxu0 %v33_v16  ;;  %133 = vmatpush.msra.mxu2 %v120_v37 }
  0x15   :  { %97 = vmatpush.msra.mxu1 %v74_v21 }
  0x16   :  { %57 = vmatpush.msra.mxu0 %v32_v18  ;;  %134 = vmatpush.msra.mxu2 %v119_v38 }
  0x17   :  { %98 = vmatpush.msra.mxu1 %v73_v23 }
  0x18   :  { %58 = vmatpush.msra.mxu0 %v31_v20  ;;  %135 = vmatpush.msra.mxu2 %v118_v39 }
  0x19   :  { %99 = vmatpush.msra.mxu1 %v72_v25 }
  0x1a   :  { %59 = vmatpush.msra.mxu0 %v30_v22  ;;  %136 = vmatpush.msra.mxu2 %v117_v40 }
  0x1b   :  { %100 = vmatpush.msra.mxu1 %v71_v27 }
  0x1c   :  { %60 = vmatpush.msra.mxu0 %v29_v24  ;;  %137 = vmatpush.msra.mxu2 %v116_v41 }
  0x1d   :  { %101 = vmatpush.msra.mxu1 %v70_v30 }
  0x1e   :  { %61 = vmatpush.msra.mxu0 %v28_v26  ;;  %138 = vmatpush.msra.mxu2 %v115_v42 }
  0x1f   :  { %102 = vmatpush.msra.mxu1 %v69_v31 }
  0x20   :  { %62 = vmatpush.msra.mxu0 %v27_v28  ;;  %139 = vmatpush.msra.mxu2 %v114_v43 }
  0x21   :  { %63 = vmatmul.f32.vlgmr.msra.gmra.mxu0 %v26_v29  ;;  %103 = vmatpush.msra.mxu1 %v68_v32 }
  0x22   :  { %140 = vmatpush.msra.mxu2 %v113_v44 }
  0x24   :  { %141 = vmatpush.msra.mxu2 %v112_v45 }
  0x26   :  { %142 = vmatpush.msra.mxu2 %v111_v50 }
  0x28   :  { %143 = vmatpush.msra.mxu2 %v110_v51 }
  0x2a   :  { %144 = vmatpush.msra.mxu2 %v109_v52 }
  0x9e   :  { %v64_v47 = vpop.f32.mrf.mxu0 }
  0x9f   :  { %v65_v48 = vadd.f32 %v154_v46, %v64_v47 }
  0xa1   :  { %v67_v49 = vmax.f32 %v65_v48, 0.0 }
  0xa3   :  { %104 = vmatmul.f32.vlgmr.msra.gmra.mxu1 %v67_v49 }
 0x120   :  { %v105_v54 = vpop.f32.mrf.mxu1 }
 0x121   :  { %v106_v55 = vadd.f32 %v155_v53, %v105_v54 }
 0x123   :  { %v108_v56 = vmax.f32 %v106_v55, 0.0 }
 0x125   :  { %145 = vmatmul.f32.vlgmr.msra.gmra.mxu2 %v108_v56 }
 0x1a8   :  { %v146_v58 = vpop.f32.mrf.mxu2 }
 0x1a9   :  { %v147_v59 = vadd.f32 %v156_v57, %v146_v58 }
 0x1ab   :  { %149 = vst [vmem:[%s363_s7] sm:$0xff] %v147_v59 }

</bundles_post_ra>
